<compile_context>
chip_gen: v7x
topology: tpu7x:2x2x1
jax: 0.10.0
libtpu: 0.0.40
codegen_flags: <defaults>
</compile_context>

<pallas_src>
import functools
import math

import jax
import jax.numpy as jnp
from jax.experimental import pallas as pl
from jax.experimental.pallas import tpu as pltpu

# ----------------------------- model config (constructor args) -----------------------------
EMBED_DIMS = [64, 128, 256, 512]
NUM_HEADS = [1, 2, 4, 8]
MLP_RATIOS = [2, 2, 2, 2]
DEPTHS = [1, 1, 1, 1]
SR_RATIOS = [8, 4, 2, 1]
IN_CHANS = 3


def rup(x, m):
    return (x + m - 1) // m * m


# =============================== Pallas kernels (hot paths) ================================

def _mm_kernel(a_ref, b_ref, s_ref, t_ref, o_ref, acc_ref, *, act):
    @pl.when(pl.program_id(2) == 0)
    def _():
        acc_ref[...] = jnp.zeros_like(acc_ref)

    acc_ref[...] += jnp.dot(a_ref[...], b_ref[...], preferred_element_type=jnp.float32)

    @pl.when(pl.program_id(2) == pl.num_programs(2) - 1)
    def _():
        y = acc_ref[...] * s_ref[...] + t_ref[...]
        if act == 'relu':
            y = jnp.maximum(y, 0.0)
        elif act == 'sigmoid':
            y = jax.nn.sigmoid(y)
        o_ref[...] = y.astype(o_ref.dtype)


def _pick_m_tile(M):
    if M >= 256:
        return 256, rup(M, 256)
    Mp = rup(M, 16)
    return Mp, Mp


def _pick_n_tile(N):
    Np = rup(N, 128)
    if Np >= 256 and Np % 256 == 0:
        return 256, Np
    return 128, Np


def _pick_k_tile(K):
    Kp = rup(K, 128)
    if Kp <= 1024:
        return Kp, Kp
    nb = Kp // 128
    best = 1
    for d in range(1, nb + 1):
        if nb % d == 0 and d * 128 <= 1024:
            best = d
    return best * 128, Kp


def matmul(a, b, scale=None, shift=None, act=None, out_dtype=jnp.float32):
    """act((a @ b) * scale + shift).  bf16 MXU feeds, fp32 accumulation, fused epilogue."""
    M, K = a.shape
    K2, N = b.shape
    assert K == K2
    a = a.astype(jnp.bfloat16)
    b = b.astype(jnp.bfloat16)
    TM, Mp = _pick_m_tile(M)
    TN, Np = _pick_n_tile(N)
    TK, Kp = _pick_k_tile(K)
    if (Mp, Kp) != (M, K):
        a = jnp.pad(a, ((0, Mp - M), (0, Kp - K)))
    if (Kp, Np) != (K, N):
        b = jnp.pad(b, ((0, Kp - K), (0, Np - N)))
    s = jnp.ones((N,), jnp.float32) if scale is None else scale.astype(jnp.float32)
    t = jnp.zeros((N,), jnp.float32) if shift is None else shift.astype(jnp.float32)
    s = jnp.pad(s.reshape(1, N), ((0, 0), (0, Np - N)))
    t = jnp.pad(t.reshape(1, N), ((0, 0), (0, Np - N)))
    out = pl.pallas_call(
        functools.partial(_mm_kernel, act=act),
        out_shape=jax.ShapeDtypeStruct((Mp, Np), out_dtype),
        grid_spec=pltpu.PrefetchScalarGridSpec(
            num_scalar_prefetch=0,
            grid=(Mp // TM, Np // TN, Kp // TK),
            in_specs=[pl.BlockSpec((TM, TK), lambda i, j, k: (i, k)),
                      pl.BlockSpec((TK, TN), lambda i, j, k: (k, j)),
                      pl.BlockSpec((1, TN), lambda i, j, k: (0, j)),
                      pl.BlockSpec((1, TN), lambda i, j, k: (0, j))],
            out_specs=pl.BlockSpec((TM, TN), lambda i, j, k: (i, j)),
            scratch_shapes=[pltpu.VMEM((TM, TN), jnp.float32)]),
        compiler_params=pltpu.CompilerParams(
            dimension_semantics=("parallel", "parallel", "arbitrary")),
    )(a, b, s, t)
    if (Mp, Np) != (M, N):
        out = out[:M, :N]
    return out


def _ln_kernel(x_ref, g_ref, b_ref, o_ref):
    x = x_ref[...]
    mu = jnp.mean(x, axis=-1, keepdims=True)
    var = jnp.mean(jnp.square(x - mu), axis=-1, keepdims=True)
    o_ref[...] = (x - mu) * jax.lax.rsqrt(var + 1e-5) * g_ref[...] + b_ref[...]


def _row_tile(Mp):
    for t in (256, 128, 64, 32, 16, 8):
        if Mp % t == 0:
            return t
    return Mp


def layernorm(x, g, b):
    """Row-wise LayerNorm over the last dim (eps=1e-5, matching nn.LayerNorm)."""
    M, C = x.shape
    Mp = rup(M, 8)
    xp = x.astype(jnp.float32)
    if Mp != M:
        xp = jnp.pad(xp, ((0, Mp - M), (0, 0)))
    TM = _row_tile(Mp)
    out = pl.pallas_call(
        _ln_kernel,
        out_shape=jax.ShapeDtypeStruct((Mp, C), jnp.float32),
        grid=(Mp // TM,),
        in_specs=[pl.BlockSpec((TM, C), lambda i: (i, 0)),
                  pl.BlockSpec((1, C), lambda i: (0, 0)),
                  pl.BlockSpec((1, C), lambda i: (0, 0))],
        out_specs=pl.BlockSpec((TM, C), lambda i: (i, 0)),
    )(xp, g.reshape(1, C).astype(jnp.float32), b.reshape(1, C).astype(jnp.float32))
    return out if Mp == M else out[:M]


def _attn_kernel(q_ref, k_ref, v_ref, o_ref, *, scale):
    q = q_ref[0]
    k = k_ref[0]
    v = v_ref[0]
    s = jax.lax.dot_general(q, k, (((1,), (1,)), ((), ())),
                            preferred_element_type=jnp.float32) * scale
    m = jnp.max(s, axis=-1, keepdims=True)
    e = jnp.exp(s - m)
    p = e * pl.reciprocal(jnp.sum(e, axis=-1, keepdims=True), approx=True)
    o = jnp.dot(p.astype(v.dtype), v, preferred_element_type=jnp.float32)
    o_ref[0] = o.astype(o_ref.dtype)


def _pick_seq_tile(N):
    for t in (256, 128, 64, 32, 16, 8):
        if N % t == 0:
            return t
    return N


def fused_attention(q, k, v, scale):
    """q (BH,N,hd), k/v (BH,Nk,hd) -> softmax(q k^T * scale) v in one fused kernel."""
    BH, N, hd = q.shape
    Nk = k.shape[1]
    TQ = _pick_seq_tile(N)
    return pl.pallas_call(
        functools.partial(_attn_kernel, scale=scale),
        out_shape=jax.ShapeDtypeStruct((BH, N, hd), jnp.float32),
        grid=(BH, N // TQ),
        in_specs=[pl.BlockSpec((1, TQ, hd), lambda b, i: (b, i, 0)),
                  pl.BlockSpec((1, Nk, hd), lambda b, i: (b, 0, 0)),
                  pl.BlockSpec((1, Nk, hd), lambda b, i: (b, 0, 0))],
        out_specs=pl.BlockSpec((1, TQ, hd), lambda b, i: (b, i, 0)),
        compiler_params=pltpu.CompilerParams(
            dimension_semantics=("parallel", "parallel")),
    )(q.astype(jnp.bfloat16), k.astype(jnp.bfloat16), v.astype(jnp.bfloat16))


def _cross_kernel(q_ref, k_ref, v_ref, o_ref, acc_ref, *, flip):
    @pl.when(pl.program_id(2) == 0)
    def _():
        acc_ref[...] = jnp.zeros_like(acc_ref)

    s = jax.nn.sigmoid(q_ref[0] * k_ref[0])            # (TQ,1)*(1,TK) -> (TQ,TK)
    if flip:
        s = 1.0 - s
    acc_ref[...] += jnp.dot(s.astype(jnp.bfloat16), v_ref[0],
                            preferred_element_type=jnp.float32)

    @pl.when(pl.program_id(2) == pl.num_programs(2) - 1)
    def _():
        o_ref[0] = acc_ref[...]


def cross_attention(q, k, v, flip):
    """out[b,n,c] = sum_m f(sigmoid(q[b,n]*k[b,m])) * v[b,m,c];  f = 1-x if flip else x.
    The NxN score matrix is never materialized in HBM."""
    B, N = q.shape
    C2 = v.shape[-1]
    TQ = _pick_seq_tile(N)
    TK = TQ
    return pl.pallas_call(
        functools.partial(_cross_kernel, flip=flip),
        out_shape=jax.ShapeDtypeStruct((B, N, C2), jnp.float32),
        grid_spec=pltpu.PrefetchScalarGridSpec(
            num_scalar_prefetch=0,
            grid=(B, N // TQ, N // TK),
            in_specs=[pl.BlockSpec((1, TQ, 1), lambda b, i, j: (b, i, 0)),
                      pl.BlockSpec((1, 1, TK), lambda b, i, j: (b, 0, j)),
                      pl.BlockSpec((1, TK, C2), lambda b, i, j: (b, j, 0))],
            out_specs=pl.BlockSpec((1, TQ, C2), lambda b, i, j: (b, i, 0)),
            scratch_shapes=[pltpu.VMEM((TQ, C2), jnp.float32)]),
        compiler_params=pltpu.CompilerParams(
            dimension_semantics=("parallel", "parallel", "arbitrary")),
    )(q.reshape(B, N, 1).astype(jnp.float32),
      k.reshape(B, 1, N).astype(jnp.float32),
      v.astype(jnp.bfloat16))


def _dw_kernel(x_ref, w_ref, b_ref, o_ref, *, TH, W):
    h0 = pl.program_id(0) * TH
    acc = jnp.zeros(o_ref.shape, jnp.float32)
    for i in range(3):
        for j in range(3):
            xs = x_ref[pl.ds(h0 + i, TH), j:j + W, :]
            wk = w_ref[i * 3 + j:i * 3 + j + 1, :]
            acc = acc + xs * wk[None]
    o_ref[...] = acc + b_ref[...][None]


def depthwise3x3(x, w, b):
    """3x3 depthwise conv (groups=C, pad=1) as a single-pass Pallas VPU kernel (NHWC)."""
    B, H, W, Ch = x.shape
    w9 = jnp.transpose(w[:, 0, :, :].reshape(Ch, 9), (1, 0)).astype(jnp.float32)
    b2 = b.reshape(1, Ch).astype(jnp.float32)
    TH = min(16, H)
    outs = []
    for bi in range(B):
        xp = jnp.pad(x[bi].astype(jnp.float32), ((1, 1), (1, 1), (0, 0)))
        o = pl.pallas_call(
            functools.partial(_dw_kernel, TH=TH, W=W),
            out_shape=jax.ShapeDtypeStruct((H, W, Ch), jnp.float32),
            grid=(H // TH,),
            in_specs=[pl.BlockSpec((H + 2, W + 2, Ch), lambda h: (0, 0, 0)),
                      pl.BlockSpec((9, Ch), lambda h: (0, 0)),
                      pl.BlockSpec((1, Ch), lambda h: (0, 0))],
            out_specs=pl.BlockSpec((TH, W, Ch), lambda h: (h, 0, 0)),
        )(xp, w9, b2)
        outs.append(o)
    return jnp.stack(outs, axis=0)


# ====================================== JAX glue ops =======================================

def _fold_scale_shift(bias=None, bn=None):
    # TODO(synk): eval-mode BatchNorm (running stats) folded into the matmul epilogue;
    #             training-mode batch statistics are not replicated.
    if bn is not None:
        s = bn['g'] / jnp.sqrt(bn['rv'] + 1e-5)
        t = bn['b'] - bn['rm'] * s
        if bias is not None:
            t = t + s * bias
        return s, t
    if bias is not None:
        return None, bias
    return None, None


def im2col_nhwc(x, kh, kw, stride, padding, dilation=1):
    B, H, W, C = x.shape
    xp = jnp.pad(x, ((0, 0), (padding, padding), (padding, padding), (0, 0)))
    Ho = (H + 2 * padding - dilation * (kh - 1) - 1) // stride + 1
    Wo = (W + 2 * padding - dilation * (kw - 1) - 1) // stride + 1
    taps = []
    for i in range(kh):
        for j in range(kw):
            hi, wj = i * dilation, j * dilation
            taps.append(xp[:, hi:hi + (Ho - 1) * stride + 1:stride,
                           wj:wj + (Wo - 1) * stride + 1:stride, :])
    col = jnp.concatenate(taps, axis=-1).reshape(B * Ho * Wo, kh * kw * C)
    return col, Ho, Wo


def conv2d(x, w, stride=1, padding=0, dilation=1, bias=None, bn=None, act=None):
    """NHWC Conv2d via bf16 im2col + fused-epilogue Pallas matmul.  w is torch (Cout,Cin,kh,kw)."""
    B, H, W, C = x.shape
    Cout, Cin, kh, kw = w.shape
    if kh == 1 and kw == 1 and stride == 1 and padding == 0:
        col, Ho, Wo = x.reshape(B * H * W, C), H, W
    else:
        col, Ho, Wo = im2col_nhwc(x.astype(jnp.bfloat16), kh, kw, stride, padding, dilation)
    wm = jnp.transpose(w, (2, 3, 1, 0)).reshape(kh * kw * Cin, Cout)
    s, t = _fold_scale_shift(bias, bn)
    y = matmul(col, wm, scale=s, shift=t, act=act)
    return y.reshape(B, Ho, Wo, Cout)


def conv1x1(x, p, bn=None, act=None):
    return conv2d(x, p['w'], bias=p.get('b'), bn=bn, act=act)


def linear(x2d, p, act=None):
    return matmul(x2d, p['w'].T, shift=p.get('b'), act=act)


def _interp_indices(out_size, in_size, align_corners):
    if align_corners:
        if out_size == 1:
            src = jnp.zeros((out_size,), jnp.float32)
        else:
            src = jnp.arange(out_size, dtype=jnp.float32) * (in_size - 1) / (out_size - 1)
    else:
        src = (jnp.arange(out_size, dtype=jnp.float32) + 0.5) * (in_size / out_size) - 0.5
        src = jnp.maximum(src, 0.0)
    i0 = jnp.clip(jnp.floor(src).astype(jnp.int32), 0, in_size - 1)
    i1 = jnp.minimum(i0 + 1, in_size - 1)
    w1 = src - i0.astype(jnp.float32)
    return i0, i1, 1.0 - w1, w1


def upsample_bilinear(x, out_h, out_w, align_corners):
    B, H, W, C = x.shape
    i0, i1, wy0, wy1 = _interp_indices(out_h, H, align_corners)
    j0, j1, wx0, wx1 = _interp_indices(out_w, W, align_corners)
    top = x[:, i0, :, :] * wy0[None, :, None, None] + x[:, i1, :, :] * wy1[None, :, None, None]
    return top[:, :, j0, :] * wx0[None, None, :, None] + top[:, :, j1, :] * wx1[None, None, :, None]


def adaptive_avg_pool(x, oh, ow):
    B, H, W, C = x.shape
    rows = []
    for i in range(oh):
        hs, he = (i * H) // oh, -(-((i + 1) * H) // oh)
        cols = []
        for j in range(ow):
            ws, we = (j * W) // ow, -(-((j + 1) * W) // ow)
            cols.append(jnp.mean(x[:, hs:he, ws:we, :], axis=(1, 2)))
        rows.append(jnp.stack(cols, axis=1))
    return jnp.stack(rows, axis=1)                     # (B, oh, ow, C)


# =================================== PVT encoder pieces ====================================

def patch_embed(p, x, stride, patch):
    y = conv2d(x, p['conv']['w'], stride=stride, padding=patch // 2, bias=p['conv']['b'])
    B, H, W, E = y.shape
    tok = layernorm(y.reshape(B * H * W, E), p['ln']['g'], p['ln']['b']).reshape(B, H * W, E)
    return tok, H, W


def attention(p, x, H, W, heads, sr):
    B, N, C = x.shape
    hd = C // heads
    scale = hd ** -0.5
    q = linear(x.reshape(B * N, C), p['q'])
    if sr > 1:
        xsr = conv2d(x.reshape(B, H, W, C), p['sr']['w'], stride=sr, bias=p['sr']['b'])
        _, Hs, Ws, _ = xsr.shape
        Nk = Hs * Ws
        xk = layernorm(xsr.reshape(B * Nk, C), p['sr_ln']['g'], p['sr_ln']['b'])
    else:
        Nk = N
        xk = x.reshape(B * N, C)
    kv = linear(xk, p['kv']).reshape(B, Nk, 2, heads, hd)
    k = jnp.transpose(kv[:, :, 0], (0, 2, 1, 3)).reshape(B * heads, Nk, hd)
    v = jnp.transpose(kv[:, :, 1], (0, 2, 1, 3)).reshape(B * heads, Nk, hd)
    qh = jnp.transpose(q.reshape(B, N, heads, hd), (0, 2, 1, 3)).reshape(B * heads, N, hd)
    o = fused_attention(qh, k, v, scale)
    o = jnp.transpose(o.reshape(B, heads, N, hd), (0, 2, 1, 3)).reshape(B * N, C)
    o = linear(o, p['proj'])
    return o.reshape(B, N, C)


def mlp_block(p, x, H, W):
    B, N, C = x.shape
    h = linear(x.reshape(B * N, C), p['fc1'])
    Hd = h.shape[-1]
    himg = depthwise3x3(h.reshape(B, H, W, Hd), p['dw']['w'], p['dw']['b'])
    h = jax.nn.gelu(himg.reshape(B * N, Hd), approximate=False)
    o = linear(h, p['fc2'])
    return o.reshape(B, N, C)


def block(p, x, H, W, heads, sr):
    B, N, C = x.shape
    y = layernorm(x.reshape(B * N, C), p['ln1']['g'], p['ln1']['b']).reshape(B, N, C)
    x = x + attention(p['attn'], y, H, W, heads, sr)       # drop_path rate 0 -> identity
    y = layernorm(x.reshape(B * N, C), p['ln2']['g'], p['ln2']['b']).reshape(B, N, C)
    x = x + mlp_block(p['mlp'], y, H, W)
    return x


# ===================================== decoder pieces ======================================

def cbam_fwd(p, x):
    B, H, W, C = x.shape
    w1 = p['fc1_w'].reshape(-1, C)                         # (C/r, C)
    w2 = p['fc2_w'].reshape(C, -1)                         # (C, C/r)
    pooled = jnp.stack([jnp.max(x, axis=(1, 2)), jnp.mean(x, axis=(1, 2))], 0).reshape(2 * B, C)
    # tiny (2B, C) GEMM: kept on jnp.dot; a padded 128-row MXU call would be 99% wasted work
    h = jnp.maximum(jnp.dot(pooled, w1.T), 0.0)
    mlp_out = jnp.dot(h, w2.T).reshape(2, B, C)
    channel_out = jax.nn.sigmoid(mlp_out[0] + mlp_out[1])
    x = channel_out[:, None, None, :] * x
    mx = jnp.max(x, axis=-1, keepdims=True)
    av = jnp.mean(x, axis=-1, keepdims=True)
    sp = conv2d(jnp.concatenate([mx, av], axis=-1), p['sp_w'], padding=3, act='sigmoid')
    return sp * x


def cross_module_fwd(p, x1, x2):
    B, H, W, C = x1.shape
    N = H * W
    q1 = jnp.max(conv1x1(x1, p['q1']), axis=-1).reshape(B, N)
    k1 = jnp.max(conv1x1(x1, p['k1']), axis=-1).reshape(B, N)
    v1 = conv1x1(x1, p['v1']).reshape(B, N, C // 2)
    q2 = jnp.mean(conv1x1(x2, p['q2']), axis=-1).reshape(B, N)
    k2 = jnp.mean(conv1x1(x2, p['k2']), axis=-1).reshape(B, N)
    v2 = conv1x1(x2, p['v2']).reshape(B, N, C // 2)
    o1 = cross_attention(q1, k2, v1, flip=True).reshape(B, H, W, C // 2)
    o2 = cross_attention(q2, k1, v2, flip=False).reshape(B, H, W, C // 2)
    out1 = conv1x1(o1, p['c2'])
    out2 = conv1x1(o2, p['c1'])
    out1 = x1 + p['gamma1'].reshape(1, 1, 1, 1) * out1
    out2 = x2 + p['gamma2'].reshape(1, 1, 1, 1) * out2
    return out1, out2


def bem_fwd(p, low, high):
    x = jax.nn.sigmoid(low) * high
    y = conv2d(x, p['conv2']['w'], padding=1, bn=p['conv2']['bn'], act='relu')
    return high + y


def deform_conv3x3(x, offset, w, b):
    """torchvision-style DeformConv2d, k=3, stride=1, pad=1 (NHWC).
    TODO(synk): bilinear gather still goes through XLA take_along_axis; a VMEM-resident Pallas
    gather (the 64x64x128 slab fits in VMEM) would remove the repeated HBM reads."""
    B, H, W, C = x.shape
    Co = w.shape[0]
    x_flat = x.reshape(B, H * W, C)
    base_y = jnp.arange(H, dtype=jnp.float32)[None, :, None]
    base_x = jnp.arange(W, dtype=jnp.float32)[None, None, :]
    taps = []
    for kk in range(9):
        i, j = kk // 3, kk % 3
        py = base_y + (i - 1) + offset[..., 2 * kk]
        px = base_x + (j - 1) + offset[..., 2 * kk + 1]
        y0 = jnp.floor(py)
        x0 = jnp.floor(px)
        val = jnp.zeros((B, H * W, C), jnp.float32)
        for yy, wy in ((y0, (y0 + 1.0) - py), (y0 + 1.0, py - y0)):
            for xx, wx in ((x0, (x0 + 1.0) - px), (x0 + 1.0, px - x0)):
                valid = ((yy >= 0) & (yy <= H - 1) & (xx >= 0) & (xx <= W - 1)).astype(jnp.float32)
                yc = jnp.clip(yy, 0, H - 1).astype(jnp.int32)
                xc = jnp.clip(xx, 0, W - 1).astype(jnp.int32)
                idx = (yc * W + xc).reshape(B, H * W, 1)
                g = jnp.take_along_axis(x_flat, jnp.broadcast_to(idx, (B, H * W, C)), axis=1)
                val = val + g * (wy * wx * valid).reshape(B, H * W, 1)
        taps.append(val)
    samp = jnp.stack(taps, axis=3)                        # (B, HW, C, 9)
    col = samp.reshape(B * H * W, C * 9).astype(jnp.bfloat16)
    out = matmul(col, w.reshape(Co, C * 9).T, shift=b)
    return out.reshape(B, H, W, Co)


def dmfm_fwd(p, x):
    # seq1: adaptive avg pool (6,6) -> 1x1 conv -> BN -> ReLU -> Upsample to hard-coded (64,64)
    o1 = adaptive_avg_pool(x, 6, 6)
    o1 = conv2d(o1, p['s1_conv']['w'], bn=p['s1_bn'], act='relu')
    o1 = upsample_bilinear(o1, 64, 64, align_corners=False)
    # seq2: 3x3 / 5x5 / 7x7 conv-bn-relu chain (fused epilogues)
    o2 = conv2d(x, p['s2_c3']['w'], padding=1, bn=p['s2_bn3'], act='relu')
    o2 = conv2d(o2, p['s2_c5']['w'], padding=2, bn=p['s2_bn5'], act='relu')
    o2 = conv2d(o2, p['s2_c7']['w'], padding=3, bn=p['s2_bn7'], act='relu')
    # seq3: dilated conv chain (dil 1, 3, 5 with pads 1, 1, 7)
    o3 = conv2d(x, p['s3_c1']['w'], padding=1, dilation=1, bn=p['s3_bn1'], act='relu')
    o3 = conv2d(o3, p['s3_c2']['w'], padding=1, dilation=3, bn=p['s3_bn2'], act='relu')
    o3 = conv2d(o3, p['s3_c3']['w'], padding=7, dilation=5, bn=p['s3_bn3'], act='relu')
    # seq4: conv-bn-relu then deformable conv
    o4 = conv2d(x, p['s4_c']['w'], padding=1, bn=p['s4_bn'], act='relu')
    off = conv2d(o4, p['s4_off']['w'], padding=1)
    o4 = deform_conv3x3(o4, off, p['s4_def']['w'], p['s4_def']['b'])
    # seq5: BasicConv2 1x1
    o5 = conv2d(x, p['s5']['w'], bn=p['s5']['bn'], act='relu')
    out = jnp.concatenate([o1 + o5, o2 + o5, o3 + o5, o4 + o5, o5], axis=-1)
    return conv2d(out, p['conc1']['w'])


def final_head(p, x):
    y = conv2d(x, p['bc']['w'], padding=1, bn=p['bc']['bn'], act='relu')
    return conv2d(y, p['conv']['w'], bias=p['conv']['b'])


# ================================== parameter construction =================================

class Init:
    def __init__(self, seed=0):
        self._key = jax.random.PRNGKey(seed)

    def key(self):
        self._key, k = jax.random.split(self._key)
        return k

    def conv(self, cout, cin, kh, kw, bias=True):
        fan_out = kh * kw * cout
        w = jax.random.normal(self.key(), (cout, cin, kh, kw), jnp.float32) * math.sqrt(2.0 / fan_out)
        d = {'w': w}
        if bias:
            d['b'] = jnp.zeros((cout,), jnp.float32)
        return d

    def linear(self, cin, cout, bias=True):
        w = jax.random.normal(self.key(), (cout, cin), jnp.float32) * 0.02
        d = {'w': w}
        if bias:
            d['b'] = jnp.zeros((cout,), jnp.float32)
        return d

    def ln(self, c):
        return {'g': jnp.ones((c,), jnp.float32), 'b': jnp.zeros((c,), jnp.float32)}

    def bn(self, c):
        return {'g': jnp.ones((c,), jnp.float32), 'b': jnp.zeros((c,), jnp.float32),
                'rm': jnp.zeros((c,), jnp.float32), 'rv': jnp.ones((c,), jnp.float32)}


def build_params(init):
    P = {}
    P['pe1'] = {'conv': init.conv(EMBED_DIMS[0], IN_CHANS, 7, 7), 'ln': init.ln(EMBED_DIMS[0])}
    P['pe2'] = {'conv': init.conv(EMBED_DIMS[1], EMBED_DIMS[0], 3, 3), 'ln': init.ln(EMBED_DIMS[1])}
    P['pe3'] = {'conv': init.conv(EMBED_DIMS[2], EMBED_DIMS[1], 3, 3), 'ln': init.ln(EMBED_DIMS[2])}
    P['pe4'] = {'conv': init.conv(EMBED_DIMS[3], EMBED_DIMS[2], 3, 3), 'ln': init.ln(EMBED_DIMS[3])}

    def make_block(dim, ratio, sr):
        attn = {'q': init.linear(dim, dim, bias=False),
                'kv': init.linear(dim, dim * 2, bias=False),
                'proj': init.linear(dim, dim, bias=True)}
        if sr > 1:
            attn['sr'] = init.conv(dim, dim, sr, sr, bias=True)
            attn['sr_ln'] = init.ln(dim)
        hidden = dim * ratio
        mlpp = {'fc1': init.linear(dim, hidden), 'dw': init.conv(hidden, 1, 3, 3, bias=True),
                'fc2': init.linear(hidden, dim)}
        return {'ln1': init.ln(dim), 'attn': attn, 'ln2': init.ln(dim), 'mlp': mlpp}

    for s in range(4):
        P[f'block{s + 1}'] = [make_block(EMBED_DIMS[s], MLP_RATIOS[s], SR_RATIOS[s])
                              for _ in range(DEPTHS[s])]
        P[f'norm{s + 1}'] = init.ln(EMBED_DIMS[s])

    def make_cbam(c, r=16):
        return {'fc1_w': init.conv(c // r, c, 1, 1, bias=False)['w'],
                'fc2_w': init.conv(c, c // r, 1, 1, bias=False)['w'],
                'sp_w': init.conv(1, 2, 7, 7, bias=False)['w']}

    def make_basic(cin, cout, k):
        return {'w': init.conv(cout, cin, k, k, bias=False)['w'], 'bn': init.bn(cout)}

    P['cbam'] = make_cbam(128)
    P['cbam1'] = make_cbam(512)
    P['conv1'] = make_basic(512, 128, 1)
    d = 128
    P['SIM'] = {'q1': init.conv(d // 2, d, 1, 1), 'k1': init.conv(d // 2, d, 1, 1),
                'v1': init.conv(d // 2, d, 1, 1), 'c1': init.conv(d, d // 2, 1, 1),
                'q2': init.conv(d // 2, d, 1, 1), 'k2': init.conv(d // 2, d, 1, 1),
                'v2': init.conv(d // 2, d, 1, 1), 'c2': init.conv(d, d // 2, 1, 1),
                'gamma1': jnp.zeros((1,), jnp.float32), 'gamma2': jnp.zeros((1,), jnp.float32)}
    P['BEM'] = {'conv2': make_basic(128, 128, 3)}
    c = 128
    P['DMFM'] = {
        's1_conv': init.conv(c, c, 1, 1, bias=False), 's1_bn': init.bn(c),
        's2_c3': init.conv(c, c, 3, 3, bias=False), 's2_bn3': init.bn(c),
        's2_c5': init.conv(c, c, 5, 5, bias=False), 's2_bn5': init.bn(c),
        's2_c7': init.conv(c, c, 7, 7, bias=False), 's2_bn7': init.bn(c),
        's3_c1': init.conv(c, c, 3, 3, bias=False), 's3_bn1': init.bn(c),
        's3_c2': init.conv(c, c, 3, 3, bias=False), 's3_bn2': init.bn(c),
        's3_c3': init.conv(c, c, 3, 3, bias=False), 's3_bn3': init.bn(c),
        's4_c': init.conv(c, c, 3, 3, bias=False), 's4_bn': init.bn(c),
        's4_off': init.conv(18, c, 3, 3, bias=False),
        's4_def': init.conv(c, c, 3, 3, bias=True),
        's5': make_basic(c, c, 1),
        'conc1': init.conv(c, c * 5, 1, 1, bias=False)}
    P['final1'] = {'bc': make_basic(128, 64, 3), 'conv': init.conv(1, 64, 1, 1, bias=True)}
    P['final2'] = {'bc': make_basic(128, 64, 3), 'conv': init.conv(1, 64, 1, 1, bias=True)}
    return P


# ======================================== forward ==========================================

def forward(P, x_nchw):
    x = jnp.transpose(x_nchw, (0, 2, 3, 1)).astype(jnp.float32)   # NHWC end-to-end
    B = x.shape[0]

    # stage 1
    tok, H, W = patch_embed(P['pe1'], x, stride=4, patch=7)
    for bp in P['block1']:
        tok = block(bp, tok, H, W, NUM_HEADS[0], SR_RATIOS[0])
    tok = layernorm(tok.reshape(B * H * W, -1), P['norm1']['g'], P['norm1']['b'])
    level1 = tok.reshape(B, H, W, -1)
    # stage 2
    tok, H, W = patch_embed(P['pe2'], level1, stride=2, patch=3)
    for bp in P['block2']:
        tok = block(bp, tok, H, W, NUM_HEADS[1], SR_RATIOS[1])
    tok = layernorm(tok.reshape(B * H * W, -1), P['norm2']['g'], P['norm2']['b'])
    level2 = tok.reshape(B, H, W, -1)
    edge0 = cbam_fwd(P['cbam'], level2)
    # stage 3
    tok, H, W = patch_embed(P['pe3'], level2, stride=2, patch=3)
    for bp in P['block3']:
        tok = block(bp, tok, H, W, NUM_HEADS[2], SR_RATIOS[2])
    tok = layernorm(tok.reshape(B * H * W, -1), P['norm3']['g'], P['norm3']['b'])
    level3 = tok.reshape(B, H, W, -1)
    # stage 4
    tok, H, W = patch_embed(P['pe4'], level3, stride=2, patch=3)
    for bp in P['block4']:
        tok = block(bp, tok, H, W, NUM_HEADS[3], SR_RATIOS[3])
    tok = layernorm(tok.reshape(B * H * W, -1), P['norm4']['g'], P['norm4']['b'])
    level4 = tok.reshape(B, H, W, -1)

    # decoder
    high_level = cbam_fwd(P['cbam1'], level4)
    high_level = conv2d(high_level, P['conv1']['w'], bn=P['conv1']['bn'], act='relu')
    _, h4, w4, _ = high_level.shape
    high_level = upsample_bilinear(high_level, h4 * 4, w4 * 4, align_corners=True)
    edge_semantics, high_semantics = cross_module_fwd(P['SIM'], edge0, high_level)
    _, he, we, _ = edge_semantics.shape
    edge_semantics = upsample_bilinear(edge_semantics, he * 2, we * 2, align_corners=True)
    high_semantics = upsample_bilinear(high_semantics, he * 2, we * 2, align_corners=True)
    mask = bem_fwd(P['BEM'], edge_semantics, high_semantics)
    out1 = dmfm_fwd(P['DMFM'], mask)
    mask = final_head(P['final1'], out1)
    _, hm, wm, _ = mask.shape
    mask = upsample_bilinear(mask, hm * 4, wm * 4, align_corners=False)
    boundary = final_head(P['final2'], edge_semantics)
    _, hb, wb, _ = boundary.shape
    boundary = upsample_bilinear(boundary, hb * 4, wb * 4, align_corners=False)
    return [jnp.transpose(mask, (0, 3, 1, 2)), jnp.transpose(boundary, (0, 3, 1, 2))]


if __name__ == "__main__":
    init = Init(seed=0)
    params = build_params(init)
    # input must be 256x256: Multi_BranchesModule hard-codes Upsample(size=(64,64)) = img/4.
    x = jax.random.normal(jax.random.PRNGKey(0), (1, 3, 256, 256), jnp.float32)
    outs = forward(params, x)
    outs = jax.block_until_ready(outs)
    assert outs[0].shape == (1, 1, 256, 256) and outs[1].shape == (1, 1, 256, 256)
    print("KERNEL_OK")
</pallas_src>

<mosaic_0001>
module attributes {stable_mosaic.version = 11 : i64} {
  func.func @_mm_kernel(%arg0: i32, %arg1: i32, %arg2: i32, %arg3: memref<256x256xbf16, #tpu.memory_space<vmem>>, %arg4: memref<256x128xbf16, #tpu.memory_space<vmem>>, %arg5: memref<1x128xf32, #tpu.memory_space<vmem>>, %arg6: memref<1x128xf32, #tpu.memory_space<vmem>>, %arg7: memref<256x128xf32, #tpu.memory_space<vmem>>, %arg8: memref<256x128xf32, #tpu.memory_space<vmem>>) attributes {dimension_semantics = [#tpu.dimension_semantics<parallel>, #tpu.dimension_semantics<parallel>, #tpu.dimension_semantics<arbitrary>], iteration_bounds = array<i64: 16, 1, 1>, scalar_prefetch = 0 : i64, scratch_operands = 1 : i64, tpu.core_type = #tpu.core_type<tc>, window_params = [{transform_indices = @transform_0, window_bounds = array<i64: 256, 256>}, {transform_indices = @transform_1, window_bounds = array<i64: 256, 128>}, {transform_indices = @transform_2, window_bounds = array<i64: 1, 128>}, {transform_indices = @transform_3, window_bounds = array<i64: 1, 128>}, {transform_indices = @transform_4, window_bounds = array<i64: 256, 128>}]} {
    %c0_i32 = arith.constant 0 : i32
    %0 = arith.cmpi eq, %arg2, %c0_i32 : i32
    %1 = arith.extui %0 : i1 to i32
    %c0_i32_0 = arith.constant 0 : i32
    %2 = arith.cmpi ne, %1, %c0_i32_0 : i32
    scf.if %2 {
      %cst_10 = arith.constant 0.000000e+00 : f32
      %12 = vector.broadcast %cst_10 : f32 to vector<256x128xf32>
      %c0_11 = arith.constant 0 : index
      %c0_12 = arith.constant 0 : index
      %13 = vector.load %arg8[%c0_11, %c0_12] : memref<256x128xf32, #tpu.memory_space<vmem>>, vector<256x128xf32>
      tpu.vector_store %arg8[%c0_11, %c0_12], %12 {strides = array<i32>} : memref<256x128xf32, #tpu.memory_space<vmem>>, vector<256x128xf32>,
    } else {
    }
    %c0 = arith.constant 0 : index
    %c0_1 = arith.constant 0 : index
    %3 = vector.load %arg8[%c0, %c0_1] : memref<256x128xf32, #tpu.memory_space<vmem>>, vector<256x128xf32>
    %c0_2 = arith.constant 0 : index
    %c0_3 = arith.constant 0 : index
    %4 = vector.load %arg3[%c0_2, %c0_3] : memref<256x256xbf16, #tpu.memory_space<vmem>>, vector<256x256xbf16>
    %c0_4 = arith.constant 0 : index
    %c0_5 = arith.constant 0 : index
    %5 = vector.load %arg4[%c0_4, %c0_5] : memref<256x128xbf16, #tpu.memory_space<vmem>>, vector<256x128xbf16>
    %cst = arith.constant dense<0.000000e+00> : vector<256x128xf32>
    %6 = tpu.matmul %4, %5, %cst {dimension_numbers = #tpu.dot_dimension_numbers<[1], [0], [0], [1], [0, 0, 1, 1], [], []>} : vector<256x256xbf16>, vector<256x128xbf16>, vector<256x128xf32> -> vector<256x128xf32>
    %7 = arith.addf %3, %6 : vector<256x128xf32>
    %c0_6 = arith.constant 0 : index
    %c0_7 = arith.constant 0 : index
    %8 = vector.load %arg8[%c0_6, %c0_7] : memref<256x128xf32, #tpu.memory_space<vmem>>, vector<256x128xf32>
    tpu.vector_store %arg8[%c0_6, %c0_7], %7 {strides = array<i32>} : memref<256x128xf32, #tpu.memory_space<vmem>>, vector<256x128xf32>,
    %c0_i32_8 = arith.constant 0 : i32
    %9 = arith.cmpi eq, %arg2, %c0_i32_8 : i32
    %10 = arith.extui %9 : i1 to i32
    %c0_i32_9 = arith.constant 0 : i32
    %11 = arith.cmpi ne, %10, %c0_i32_9 : i32
    scf.if %11 {
      %c0_10 = arith.constant 0 : index
      %c0_11 = arith.constant 0 : index
      %12 = vector.load %arg8[%c0_10, %c0_11] : memref<256x128xf32, #tpu.memory_space<vmem>>, vector<256x128xf32>
      %c0_12 = arith.constant 0 : index
      %c0_13 = arith.constant 0 : index
      %13 = vector.load %arg5[%c0_12, %c0_13] : memref<1x128xf32, #tpu.memory_space<vmem>>, vector<1x128xf32>
      %14 = vector.broadcast %13 : vector<1x128xf32> to vector<256x128xf32>
      %15 = arith.mulf %12, %14 : vector<256x128xf32>
      %c0_14 = arith.constant 0 : index
      %c0_15 = arith.constant 0 : index
      %16 = vector.load %arg6[%c0_14, %c0_15] : memref<1x128xf32, #tpu.memory_space<vmem>>, vector<1x128xf32>
      %17 = vector.broadcast %16 : vector<1x128xf32> to vector<256x128xf32>
      %18 = arith.addf %15, %17 : vector<256x128xf32>
      %c0_16 = arith.constant 0 : index
      %c0_17 = arith.constant 0 : index
      %19 = vector.load %arg7[%c0_16, %c0_17] : memref<256x128xf32, #tpu.memory_space<vmem>>, vector<256x128xf32>
      tpu.vector_store %arg7[%c0_16, %c0_17], %18 {strides = array<i32>} : memref<256x128xf32, #tpu.memory_space<vmem>>, vector<256x128xf32>,
    } else {
    }
    return
  }
  func.func @transform_0(%arg0: i32, %arg1: i32, %arg2: i32) -> (i32, i32) {
    %c0_i32 = arith.constant 0 : i32
    return %arg0, %arg2 : i32, i32
  }
  func.func @transform_1(%arg0: i32, %arg1: i32, %arg2: i32) -> (i32, i32) {
    %c0_i32 = arith.constant 0 : i32
    return %arg2, %arg1 : i32, i32
  }
  func.func @transform_2(%arg0: i32, %arg1: i32, %arg2: i32) -> (i32, i32) {
    %c0_i32 = arith.constant 0 : i32
    %c0_i32_0 = arith.constant 0 : i32
    return %c0_i32, %arg1 : i32, i32
  }
  func.func @transform_3(%arg0: i32, %arg1: i32, %arg2: i32) -> (i32, i32) {
    %c0_i32 = arith.constant 0 : i32
    %c0_i32_0 = arith.constant 0 : i32
    return %c0_i32, %arg1 : i32, i32
  }
  func.func @transform_4(%arg0: i32, %arg1: i32, %arg2: i32) -> (i32, i32) {
    %c0_i32 = arith.constant 0 : i32
    return %arg0, %arg1 : i32, i32
  }
}

</mosaic_0001>

<bundles_post_ra>
// kernel: tpu_custom_call.1
= control target key start
LH: loop header
LB: loop body
LE: loop exit
PB: predicated region body
PF: predicated region fallthrough
CT: control target
= control target key end

     0   :  { %9 = vsyncpa [#allocation4], 0  ;;  %s2239_s0 = inlined_call_operand.hbm [shape: bf16[4096,256], index: 0, kind: input, shape index: {}]   ;;  %s2240_s1 = inlined_call_operand.hbm [shape: bf16[256,128], index: 1, kind: input, shape index: {}]   ;;  %s2241_s2 = inlined_call_operand.hbm [shape: f32[1,128], index: 2, kind: input, shape index: {}]   ;;  %s2242_s3 = inlined_call_operand.hbm [shape: f32[1,128], index: 3, kind: input, shape index: {}]   ;;  %s2243_s4 = inlined_call_operand.hbm [shape: f32[4096,128], index: 4, kind: output, shape index: {}]  }
   0x1   :  { %11 = vsyncpa [#allocation4 + $0x1], 0 }
   0x2   :  { %12 = vsyncpa [#allocation7], 0 }
   0x3   :  { %13 = vsyncpa [#allocation10], 0 }
   0x4   :  { %14 = vsyncpa [#allocation5], 0 }
   0x5   :  { %16 = vsyncpa [#allocation5 + $0x1], 0  ;;  %s1819_s15 = smov 0   ;;  %s1821_s16 = smov 0  }
   0x6   :  { %s1823_s17 = smov 0   ;;  %s1825_s18 = smov 0  }
   0x7   :  { %s1827_s19 = smov 0   ;;  %s1829_s20 = smov 0  }
   0x8 LB: > { %s1211_s21 = sadd.s32 4294967295, %s1781_s20   ;;  %s1212_s22 = sadd.s32 4294967294, %s1781_s20   ;;  %s1781_s20 = sphi %s1829_s20, %s22_s20   ;;  %s1777_s19 = sphi %s1827_s19, %s2269_s19   ;;  %s1773_s18 = sphi %s1825_s18, %s2268_s18   ;;  %s1769_s17 = sphi %s1823_s17, %s2267_s17   ;;  %s1765_s16 = sphi %s1821_s16, %s2266_s16   ;;  %s1761_s15 = sphi %s1819_s15, %s2265_s15  }
   0x9   : > { %p63_p0 = scmp.ne.s32.totalorder %s1765_s16, %s1761_s15  ;;  %p1853_p1 = scmp.eq.s32.totalorder %s1211_s21, 0 }
   0xa   : > { %p1857_p2 = scmp.eq.s32.totalorder %s1211_s21, 15  ;;  %p175_p3 = scmp.eq.s32.totalorder %s1212_s22, 15 }
   0xb   : > { %s2249_s23 = scalar_select %p1853_p1, 1, 0 }
   0xc   : > { %s2250_s24 = scalar_select %p1857_p2, 1, 0 }
   0xd   : > { %p1863_p4 = por %p1853_p1, %p63_p0  ;;  %p1213_p5 = scmp.ge.s32.totalorder %s1781_s20, 1 }
   0xe   : > { %p1868_p6 = por %p175_p3, %p63_p0  ;;  %p182_p7 = scmp.lt.s32.totalorder %s1781_s20, 17 }
   0xf   : > { %s2251_s25 = scalar_select %p1863_p4, 1, 0 }
  0x10   : > { %s2252_s26 = scalar_select %p1868_p6, 1, 0 }
  0x11   : > { %p1873_p8 = pnand %p1213_p5, %p182_p7  ;;  %s1783_s28 = smov [#allocation6]  }
  0x12   : > { %2253 = sst [smem:[#allocation16_spill]] %s2252_s26  ;;  %s198_s29 = sshll.u32 %s1783_s28, 4  ;;  %s1877_s29 = int_to_ptr.vmem [resolvable:$true] %s198_s29 }
  0x13   : > { %s2254_s27 = scalar_select %p1873_p8, 1, 0 }
  0x14   : > { %p1430_p9 = pneg %p1873_p8  ;;  %s1784_s5 = smov [#allocation8]  }
  0x15   : > { %s214_s6 = sshll.u32 %s1784_s5, 4  ;;  %s1785_s7 = smov [#allocation9]   ;;  %s1887_s6 = int_to_ptr.vmem [resolvable:$true] %s214_s6 }
  0x16   : > { %p1883_p10 = pnand %p1430_p9, %p1853_p1  ;;  %s1889_s8 = sshll.u32 %s1785_s7, 4  ;;  %s228_s8 = int_to_ptr.vmem [resolvable:$true] %s1889_s8 }
  0x17   : > { %s1577_s11 = scalar_lea.hbm %s2240_s1, 2048 }
  0x18   : > { %p1578_p11 = scmp.ne.s32.totalorder %s2240_s1, %s1577_s11  ;;  %p1899_p12 = pneg %p1883_p10 }
  0x19   : > { %p1584_p3 = scmp.lt.u32.totalorder %s1577_s11, %s2240_s1 }
  0x1a   : > { %p1580_p13 = pnand %p1899_p12, %p1578_p11 }
  0x1c   : > { %p1581_p0 = pneg %p1580_p13 }
  0x1e   : > { %p1586_p5 = pnand %p1584_p3, %p1581_p0 }
  0x20   : > { %1589 = shalt.err (!%p1586_p5)
}
  0x21   : > { %s1590_s28 = scalar_lea.vmem %s1877_s29, 2048  ;;  %p1598_p1 = scmp.lt.s32.totalorder %s1877_s29, %s1877_s29 }
  0x22   : > { %p1591_p7 = scmp.ne.s32.totalorder %s1877_s29, %s1590_s28  ;;  %p1599_p4 = scmp.lt.s32.totalorder %s1590_s28, %s1590_s28 }
  0x24   : > { %p1593_p9 = pnand %p1591_p7, %p1899_p12  ;;  %p1600_p11 = por %p1599_p4, %p1598_p1 }
  0x26   : > { %p1594_p6 = pneg %p1593_p9 }
  0x28   : > { %p1601_p13 = pnand %p1600_p11, %p1594_p6 }
  0x2a   : > { %1604 = shalt.err (!%p1601_p13)
}
  0x2b   : > { %s1786_s5 = smov 64   ;;  %s1787_s7 = smov 4  }
  0x2c   : > { %1433 = dma.hbm_to_vmem [thread:$0]  (!%p1883_p10), %s2240_s1, 2048, %s1877_s29, [#allocation7], %s1786_s5, %s1786_s5, %s1787_s7  }
  0x2d   : > { %s1605_s13 = scalar_lea.hbm %s2241_s2, 16 }
  0x2e   : > { %p1606_p1 = scmp.ne.s32.totalorder %s2241_s2, %s1605_s13  ;;  %p1612_p0 = scmp.lt.u32.totalorder %s1605_s13, %s2241_s2 }
  0x30   : > { %p1608_p4 = pnand %p1606_p1, %p1899_p12 }
  0x32   : > { %p1609_p6 = pneg %p1608_p4 }
  0x34   : > { %p1614_p3 = pnand %p1612_p0, %p1609_p6 }
  0x36   : > { %1617 = shalt.err (!%p1614_p3)
}
  0x37   : > { %s1618_s29 = scalar_lea.vmem %s1887_s6, 16  ;;  %s1625_s5 = scalar_lea.vmem %s1887_s6, 32 }
  0x38   : > { %p1619_p5 = scmp.ne.s32.totalorder %s1887_s6, %s1618_s29  ;;  %p1626_p11 = scmp.lt.s32.totalorder %s1887_s6, %s1887_s6 }
  0x39   : > { %p1627_p13 = scmp.lt.s32.totalorder %s1625_s5, %s1618_s29 }
  0x3a   : > { %p1621_p7 = pnand %p1619_p5, %p1899_p12 }
  0x3b   : > { %p1628_p1 = por %p1627_p13, %p1626_p11 }
  0x3c   : > { %p1622_p9 = pneg %p1621_p7 }
  0x3e   : > { %p1629_p4 = pnand %p1628_p1, %p1622_p9 }
  0x40   : > { %1632 = shalt.err (!%p1629_p4)
}
  0x41   : > { %1436 = dma.hbm_to_vmem [thread:$0]  (!%p1883_p10), %s2241_s2, 16, %s1887_s6, [#allocation7]  }
  0x42   : > { %s1633_s11 = scalar_lea.hbm %s2242_s3, 16 }
  0x43   : > { %p1634_p6 = scmp.ne.s32.totalorder %s2242_s3, %s1633_s11  ;;  %p1640_p5 = scmp.lt.u32.totalorder %s1633_s11, %s2242_s3 }
  0x45   : > { %p1636_p0 = pnand %p1634_p6, %p1899_p12 }
  0x47   : > { %p1637_p3 = pneg %p1636_p0 }
  0x49   : > { %p1642_p7 = pnand %p1640_p5, %p1637_p3 }
  0x4b   : > { %1645 = shalt.err (!%p1642_p7)
}
  0x4c   : > { %s1646_s28 = scalar_lea.vmem %s228_s8, 16  ;;  %s1653_s6 = scalar_lea.vmem %s228_s8, 32 }
  0x4d   : > { %p1647_p9 = scmp.ne.s32.totalorder %s228_s8, %s1646_s28  ;;  %p1654_p1 = scmp.lt.s32.totalorder %s228_s8, %s228_s8 }
  0x4e   : > { %p1655_p4 = scmp.lt.s32.totalorder %s1653_s6, %s1646_s28 }
  0x4f   : > { %p1649_p11 = pnand %p1647_p9, %p1899_p12 }
  0x50   : > { %p1656_p8 = por %p1655_p4, %p1654_p1 }
  0x51   : > { %p1650_p13 = pneg %p1649_p11 }
  0x53   : > { %p1657_p2 = pnand %p1656_p8, %p1650_p13 }
  0x55   : > { %1660 = shalt.err (!%p1657_p2)
}
  0x56   : > { %1439 = dma.hbm_to_vmem [thread:$0]  (!%p1883_p10), %s2242_s3, 16, %s228_s8, [#allocation10]  }
  0x57   : > { %s50_s14 = sadd.s32 1, %s1769_s17  ;;  %s41_s26 = sadd.s32 1, %s1777_s19 }
  0x58   : > { %p57_p2 = scmp.ne.s32.totalorder %s1769_s17, %s1765_s16  ;;  %p43_p8 = scmp.ge.s32.totalorder %s41_s26, 16 }
  0x59   : > { %p58_p12 = scmp.eq.s32.totalorder %s1781_s20, 0  ;;  %p2257_p6 = scmp.ne.s32.totalorder %s2250_s24, 0 }
  0x5a   : > { %p1451_p3 = scmp.lt.s32.totalorder %s1781_s20, 16  ;;  %s2271_s26 = smov (%p43_p8, %s41_s26), 0 }
  0x5b   : > { %p1970_p0 = por %p2257_p6, %p57_p2  ;;  %p59_p5 = por %p58_p12, %p57_p2 }
  0x5c   : > { %s238_s7 = sand.u32 1, %s1769_s17   ;;  %s45_s9 = ssub.s32 %s1777_s19, %s2271_s26 }
  0x5d   : > { %p48_p7 = scmp.eq.s32.totalorder %s45_s9, 0  ;;  %s1218_s8 = sshll.u32 %s238_s7, 8 }
  0x5e   : > { %s1284_s10 = sshll.u32 %s1777_s19, 12  ;;  %s242_s21 = scalar_lea.vmem [#allocation3], %s1218_s8 }
  0x5f   : > { %s1982_s11 = scalar_select %p48_p7, %s1769_s17, %s50_s14  }
  0x60   : > { %s1987_s24 = scalar_lea.hbm %s2239_s0, %s1284_s10  ;;  %s252_s22 = sshll.u32 %s242_s21, 4  ;;  %s1989_s22 = int_to_ptr.vmem [resolvable:$true] %s252_s22 }
  0x61   : > { %p1993_p10 = pnand %p1451_p3, %p59_p5  ;;  %s1997_s6 = scalar_lea.sflag [#allocation4], %s238_s7 }
  0x62   : > { %s1661_s29 = scalar_lea.hbm %s1987_s24, 4096  ;;  %s1666_s9 = scalar_lea.hbm %s2239_s0, 65536 }
  0x63   : > { %p1662_p9 = scmp.ne.s32.totalorder %s1987_s24, %s1661_s29  ;;  %p1663_p11 = pneg %p1993_p10 }
  0x64   : > { %p1667_p4 = scmp.lt.u32.totalorder %s1987_s24, %s2239_s0  ;;  %p1668_p2 = scmp.lt.u32.totalorder %s1666_s9, %s1661_s29 }
  0x65   : > { %p1664_p13 = pnand %p1663_p11, %p1662_p9  ;;  %p1670_p12 = scmp.lt.u32.totalorder %s1661_s29, %s1987_s24 }
  0x66   : > { %p1669_p8 = por %p1668_p2, %p1667_p4 }
  0x67   : > { %p1665_p1 = pneg %p1664_p13 }
  0x68   : > { %p1671_p6 = por %p1670_p12, %p1669_p8 }
  0x6a   : > { %p1672_p3 = pnand %p1671_p6, %p1665_p1 }
  0x6c   : > { %1675 = shalt.err (!%p1672_p3)
}
  0x6d   : > { %s1676_s7 = scalar_lea.vmem %s1989_s22, 4096  ;;  %s1788_s12 = smov [#allocation3]  }
  0x6e   : > { %p1677_p5 = scmp.ne.s32.totalorder %s1989_s22, %s1676_s7  ;;  %s1681_s13 = sshll.u32 %s1788_s12, 4  ;;  %s1682_s13 = int_to_ptr.vmem [resolvable:$false] %s1681_s13 }
  0x6f   : > { %s1683_s21 = scalar_lea.vmem %s1682_s13, 8192  ;;  %p1684_p13 = scmp.lt.s32.totalorder %s1989_s22, %s1682_s13 }
  0x70   : > { %p1679_p7 = pnand %p1677_p5, %p1663_p11  ;;  %p1685_p4 = scmp.lt.s32.totalorder %s1683_s21, %s1676_s7 }
  0x72   : > { %p1680_p9 = pneg %p1679_p7  ;;  %p1686_p2 = por %p1685_p4, %p1684_p13 }
  0x74   : > { %p1687_p8 = pnand %p1686_p2, %p1680_p9 }
  0x76   : > { %1690 = shalt.err (!%p1687_p8)
}
  0x77   : > { %s1789_s29 = smov 128   ;;  %s1790_s5 = smov 8  }
  0x78   : > { %1443 = dma.hbm_to_vmem [thread:$0]  (!%p1993_p10), %s1987_s24, 4096, %s1989_s22, %s1997_s6, %s1789_s29, %s1789_s29, %s1790_s5  }
  0x79   : > { %p2260_p11 = scmp.ne.s32.totalorder %s2254_s27, 0 }
  0x7a   : > { %s2028_s14 = sand.u32 (!%p2260_p11), 1, %s1765_s16   ;;  %p2261_p1 = scmp.ne.s32.totalorder (!%p2260_p11), %s2251_s25, 0 }
  0x7b   : > { %264 = sbr.rel (%p2260_p11) target bundleno = 461 (0x1cd), region = 36  ;;  %s1223_s9 = sshll.u32 (!%p2260_p11), %s2028_s14, 8 }
  0x7c   : > { %s267_s8 = scalar_lea.sflag (!%p2260_p11), [#allocation4], %s2028_s14  ;;  %s2034_s10 = scalar_lea.vmem (!%p2260_p11), [#allocation3], %s1223_s9 }
  0x82   : > { %1744 = dma.done.wait (%p2261_p1), %s267_s8, 4096  }
  0x83   : > { %1746 = vsyncadd (%p2261_p1), %s267_s8, 4294963200  ;;  %p2262_p10 = scmp.ne.s32.totalorder %s2249_s23, 0 }
  0x85   : > { %1748 = dma.done.wait (%p2262_p10), [#allocation7], 2064  }
  0x86   : > { %1750 = vsyncadd (%p2262_p10), [#allocation7], 4294965232 }
  0x87   : > { %1752 = dma.done.wait (%p2262_p10), [#allocation10], 16  }
  0x88   : > { %1754 = vsyncadd (%p2262_p10), [#allocation10], 4294967280  ;;  %v1513_v0 = vld [vmem:[#allocation6 + $0x40] sm:$0xff]   ;;  %v1515_v2 = vld [vmem:[#allocation6 + $0x48] sm:$0xff]   ;;  %s2092_s23 = scalar_lea.vmem [#allocation11], %s1223_s9  ;;  %s1285_s25 = sshll.u32 %s1773_s18, 12 }
  0x89   : > { %v1514_v1 = vld [vmem:[#allocation6] sm:$0xff]   ;;  %1286 = vmatprep.subr.bf16.mxu0 %v1513_v0  ;;  %1398 = vmatprep.subr.bf16.mxu1 %v1513_v0  ;;  %v1516_v3 = vld [vmem:[#allocation6 + $0x8] sm:$0xff]   ;;  %v1517_v4 = vld [vmem:[#allocation6 + $0x50] sm:$0xff]   ;;  %s1085_s27 = sshll.u32 %s2092_s23, 4  ;;  %s2183_s28 = scalar_lea.hbm %s2243_s4, %s1285_s25  ;;  %s2185_s27 = int_to_ptr.vmem [resolvable:$true] %s1085_s27 }
  0x8a   : > { %1287 = vmatpush3.bf16.msra.mxu0 %v1514_v1  ;;  %1406 = vmatpush3.bf16.msra.mxu1 %v1514_v1  ;;  %v1518_v5 = vld [vmem:[#allocation6 + $0x10] sm:$0xff]   ;;  %v1519_v6 = vld [vmem:[#allocation6 + $0x58] sm:$0xff]   ;;  %v1521_v8 = vld [vmem:[#allocation6 + $0x60] sm:$0xff]   ;;  %s1071_s18 = scalar_lea.sflag [#allocation5], %s2028_s14  ;;  %s1691_s6 = scalar_lea.vmem %s2185_s27, 4096 }
  0x8b   : > { %1288 = vmatprep.subr.bf16.mxu0 %v1515_v2  ;;  %1399 = vmatprep.subr.bf16.mxu1 %v1515_v2  ;;  %v1520_v7 = vld [vmem:[#allocation6 + $0x18] sm:$0xff]   ;;  %v1522_v9 = vld [vmem:[#allocation6 + $0x20] sm:$0xff]   ;;  %v1523_v10 = vld [vmem:[#allocation6 + $0x68] sm:$0xff]   ;;  %p1692_p12 = scmp.ne.s32.totalorder %s2185_s27, %s1691_s6  ;;  %s1791_s7 = smov [#allocation11]  }
  0x8c   : > { %v1531_v11 = vld [vmem:[%s2034_s10 + $0x4] ss:$8 sps:$4 sm:$0xff]   ;;  %v1525_v14 = vld [vmem:[#allocation6 + $0x70] sm:$0xff]   ;;  %v1527_v16 = vld [vmem:[#allocation6 + $0x78] sm:$0xff]   ;;  %s1695_s12 = sshll.u32 %s1791_s7, 4  ;;  %s1696_s12 = int_to_ptr.vmem [resolvable:$false] %s1695_s12 }
  0x8d   : > { %v1534_v12 = vld [vmem:[%s2034_s10 + $0x84] ss:$8 sps:$4 sm:$0xff]   ;;  %732 = vmatprep.mubr.bf16.mxu0 %v1531_v11  ;;  %v1526_v15 = vld [vmem:[#allocation6 + $0x30] sm:$0xff]   ;;  %v1528_v17 = vld [vmem:[#allocation6 + $0x38] sm:$0xff]   ;;  %p1693_p6 = pnand %p1692_p12, %p1970_p0  ;;  %s1697_s13 = scalar_lea.vmem %s1696_s12, 8192 }
  0x8e   : > { %1289 = vmatpush3.bf16.msra.mxu0 %v1516_v3  ;;  %1407 = vmatpush3.bf16.msra.mxu1 %v1516_v3  ;;  %v1524_v13 = vld [vmem:[#allocation6 + $0x28] sm:$0xff]   ;;  %v1535_v20 = vld [vmem:[%s2034_s10 + $0x14] ss:$8 sps:$4 sm:$0xff]   ;;  %v1539_v22 = vld [vmem:[%s2034_s10 + $0x10] ss:$8 sps:$4 sm:$0xff]   ;;  %p1698_p5 = scmp.lt.s32.totalorder %s2185_s27, %s1696_s12  ;;  %p1699_p7 = scmp.lt.s32.totalorder %s1697_s13, %s1691_s6 }
  0x8f   : > { %1290 = vmatprep.subr.bf16.mxu0 %v1517_v4  ;;  %1400 = vmatprep.subr.bf16.mxu1 %v1517_v4  ;;  %v1529_v18 = vld [vmem:[%s2034_s10] ss:$8 sps:$4 sm:$0xff]   ;;  %v1537_v21 = vld [vmem:[%s2034_s10 + $0x94] ss:$8 sps:$4 sm:$0xff]   ;;  %v1540_v23 = vld [vmem:[%s2034_s10 + $0x90] ss:$8 sps:$4 sm:$0xff]   ;;  %p1694_p3 = pneg %p1693_p6 }
  0x90   : > { %796 = vmatprep.mubr.bf16.mxu1 %v1534_v12  ;;  %v1532_v19 = vld [vmem:[%s2034_s10 + $0x80] ss:$8 sps:$4 sm:$0xff]   ;;  %v1541_v24 = vld [vmem:[%s2034_s10 + $0x24] ss:$8 sps:$4 sm:$0xff]   ;;  %v1547_v28 = vld [vmem:[%s2034_s10 + $0x34] ss:$8 sps:$4 sm:$0xff]   ;;  %p1700_p9 = por %p1699_p7, %p1698_p5 }
  0x91   : > { %v1543_v25 = vld [vmem:[%s2034_s10 + $0xa4] ss:$8 sps:$4 sm:$0xff]   ;;  %v1545_v26 = vld [vmem:[%s2034_s10 + $0x20] ss:$8 sps:$4 sm:$0xff]   ;;  %v1549_v29 = vld [vmem:[%s2034_s10 + $0xb4] ss:$8 sps:$4 sm:$0xff]  }
  0x92   : > { %1291 = vmatpush3.bf16.msra.mxu0 %v1518_v5  ;;  %1408 = vmatpush3.bf16.msra.mxu1 %v1518_v5  ;;  %v1546_v27 = vld [vmem:[%s2034_s10 + $0xa0] ss:$8 sps:$4 sm:$0xff]   ;;  %v1551_v30 = vld [vmem:[%s2034_s10 + $0x30] ss:$8 sps:$4 sm:$0xff]   ;;  %v1553_v32 = vld [vmem:[%s2034_s10 + $0x44] ss:$8 sps:$4 sm:$0xff]   ;;  %p1701_p13 = pnand %p1700_p9, %p1694_p3 }
  0x93   : > { %1292 = vmatprep.subr.bf16.mxu0 %v1519_v6  ;;  %1401 = vmatprep.subr.bf16.mxu1 %v1519_v6  ;;  %v1552_v31 = vld [vmem:[%s2034_s10 + $0xb0] ss:$8 sps:$4 sm:$0xff]   ;;  %v1555_v33 = vld [vmem:[%s2034_s10 + $0xc4] ss:$8 sps:$4 sm:$0xff]   ;;  %v1557_v34 = vld [vmem:[%s2034_s10 + $0x40] ss:$8 sps:$4 sm:$0xff]  }
  0x94   : > { %v1558_v35 = vld [vmem:[%s2034_s10 + $0xc0] ss:$8 sps:$4 sm:$0xff]   ;;  %v1559_v36 = vld [vmem:[%s2034_s10 + $0x54] ss:$8 sps:$4 sm:$0xff]   ;;  %v1563_v38 = vld [vmem:[%s2034_s10 + $0x50] ss:$8 sps:$4 sm:$0xff]  }
  0x95   : > { %v1561_v37 = vld [vmem:[%s2034_s10 + $0xd4] ss:$8 sps:$4 sm:$0xff]   ;;  %v1564_v39 = vld [vmem:[%s2034_s10 + $0xd0] ss:$8 sps:$4 sm:$0xff]   ;;  %v1565_v40 = vld [vmem:[%s2034_s10 + $0x64] ss:$8 sps:$4 sm:$0xff]  }
  0x96   : > { %1293 = vmatpush3.bf16.msra.mxu0 %v1520_v7  ;;  %1409 = vmatpush3.bf16.msra.mxu1 %v1520_v7  ;;  %v1567_v41 = vld [vmem:[%s2034_s10 + $0xe4] ss:$8 sps:$4 sm:$0xff]   ;;  %v1569_v42 = vld [vmem:[%s2034_s10 + $0x60] ss:$8 sps:$4 sm:$0xff]   ;;  %v1571_v44 = vld [vmem:[%s2034_s10 + $0x74] ss:$8 sps:$4 sm:$0xff]  }
  0x97   : > { %1294 = vmatprep.subr.bf16.mxu0 %v1521_v8  ;;  %1402 = vmatprep.subr.bf16.mxu1 %v1521_v8  ;;  %v1570_v43 = vld [vmem:[%s2034_s10 + $0xe0] ss:$8 sps:$4 sm:$0xff]   ;;  %v1573_v45 = vld [vmem:[%s2034_s10 + $0xf4] ss:$8 sps:$4 sm:$0xff]   ;;  %v1575_v46 = vld [vmem:[%s2034_s10 + $0x70] ss:$8 sps:$4 sm:$0xff]  }
  0x98   : > { %v1576_v47 = vld [vmem:[%s2034_s10 + $0xf0] ss:$8 sps:$4 sm:$0xff]   ;;  %v2080_v51 = vld [vmem:[#allocation8] ss:$0 sm:$0xff]  ;;  %v2082_v57 = vld [vmem:[#allocation9] ss:$0 sm:$0xff] }
  0x9a   : > { %1295 = vmatpush3.bf16.msra.mxu0 %v1522_v9  ;;  %1410 = vmatpush3.bf16.msra.mxu1 %v1522_v9 }
  0x9b   : > { %1296 = vmatprep.subr.bf16.mxu0 %v1523_v10  ;;  %1403 = vmatprep.subr.bf16.mxu1 %v1523_v10 }
  0x9e   : > { %1297 = vmatpush3.bf16.msra.mxu0 %v1524_v13  ;;  %1411 = vmatpush3.bf16.msra.mxu1 %v1524_v13 }
  0x9f   : > { %1298 = vmatprep.subr.bf16.mxu0 %v1525_v14  ;;  %1404 = vmatprep.subr.bf16.mxu1 %v1525_v14 }
  0xa2   : > { %1299 = vmatpush3.bf16.msra.mxu0 %v1526_v15  ;;  %1412 = vmatpush3.bf16.msra.mxu1 %v1526_v15 }
  0xa3   : > { %1300 = vmatprep.subr.bf16.mxu0 %v1527_v16  ;;  %1405 = vmatprep.subr.bf16.mxu1 %v1527_v16 }
  0xa6   : > { %1301 = vmatpush3.bf16.msra.mxu0 %v1528_v17  ;;  %1413 = vmatpush3.bf16.msra.mxu1 %v1528_v17 }
  0xa9   : > { %733 = vmatmul.mubr.bf16.vlgmr.msra.gmra.mrb[0].mxu0 %v1529_v18  ;;  %797 = vmatmul.mubr.bf16.vlgmr.msra.gmra.mrb[0].mxu1 %v1532_v19 }
  0xaa   : > { %740 = vmatprep.mubr.bf16.mxu0 %v1535_v20  ;;  %804 = vmatprep.mubr.bf16.mxu1 %v1537_v21 }
  0xb1   : > { %741 = vmatmul.mubr.bf16.gmra.mrb[4].mxu0 %v1539_v22  ;;  %805 = vmatmul.mubr.bf16.gmra.mrb[4].mxu1 %v1540_v23 }
  0xb2   : > { %748 = vmatprep.mubr.bf16.mxu0 %v1541_v24  ;;  %812 = vmatprep.mubr.bf16.mxu1 %v1543_v25 }
  0xb9   : > { %749 = vmatmul.mubr.bf16.gmra.mrb[8].mxu0 %v1545_v26  ;;  %813 = vmatmul.mubr.bf16.gmra.mrb[8].mxu1 %v1546_v27 }
  0xba   : > { %756 = vmatprep.mubr.bf16.mxu0 %v1547_v28  ;;  %820 = vmatprep.mubr.bf16.mxu1 %v1549_v29 }
  0xc1   : > { %757 = vmatmul.mubr.bf16.gmra.mrb[12].mxu0 %v1551_v30  ;;  %821 = vmatmul.mubr.bf16.gmra.mrb[12].mxu1 %v1552_v31 }
  0xc2   : > { %764 = vmatprep.mubr.bf16.mxu0 %v1553_v32  ;;  %828 = vmatprep.mubr.bf16.mxu1 %v1555_v33 }
  0xc9   : > { %765 = vmatmul.mubr.bf16.gmra.mrb[16].mxu0 %v1557_v34  ;;  %829 = vmatmul.mubr.bf16.gmra.mrb[16].mxu1 %v1558_v35 }
  0xca   : > { %772 = vmatprep.mubr.bf16.mxu0 %v1559_v36  ;;  %836 = vmatprep.mubr.bf16.mxu1 %v1561_v37 }
  0xd1   : > { %773 = vmatmul.mubr.bf16.gmra.mrb[20].mxu0 %v1563_v38  ;;  %837 = vmatmul.mubr.bf16.gmra.mrb[20].mxu1 %v1564_v39 }
  0xd2   : > { %780 = vmatprep.mubr.bf16.mxu0 %v1565_v40  ;;  %844 = vmatprep.mubr.bf16.mxu1 %v1567_v41 }
  0xd9   : > { %781 = vmatmul.mubr.bf16.gmra.mrb[24].mxu0 %v1569_v42  ;;  %845 = vmatmul.mubr.bf16.gmra.mrb[24].mxu1 %v1570_v43 }
  0xda   : > { %788 = vmatprep.mubr.bf16.mxu0 %v1571_v44  ;;  %852 = vmatprep.mubr.bf16.mxu1 %v1573_v45 }
  0xe1   : > { %789 = vmatmul.mubr.bf16.gmra.mrb[28].mxu0 %v1575_v46  ;;  %853 = vmatmul.mubr.bf16.gmra.mrb[28].mxu1 %v1576_v47 }
 0x17c   : > { %v1302_v48 = vpop.f32.mrb[0].mxu0  ;;  %v1350_v49 = vpop.f32.mrb[0].mxu1 }
 0x17d   : > { %v1303_v50 = vpop.f32.mrb[1].mxu0  ;;  %v1351_v52 = vpop.f32.mrb[1].mxu1 }
 0x17e   : > { %v1304_v53 = vadd.f32 %v1303_v50, %v1302_v48  ;;  %v1352_v54 = vadd.f32 %v1351_v52, %v1350_v49  ;;  %v1305_v55 = vpop.f32.mrb[2].mxu0  ;;  %v1353_v56 = vpop.f32.mrb[2].mxu1 }
 0x17f   : > { %v1306_v58 = vpop.f32.mrb[3].mxu0  ;;  %v1354_v59 = vpop.f32.mrb[3].mxu1 }
 0x180   : > { %v967_v60 = vmul.f32 %v1304_v53, %v2080_v51  ;;  %v983_v61 = vmul.f32 %v1352_v54, %v2080_v51  ;;  %v1307_v62 = vadd.f32 %v1306_v58, %v1305_v55  ;;  %v1355_v63 = vadd.f32 %v1354_v59, %v1353_v56 }
 0x182   : > { %v1006_v0 = vadd.f32 %v2082_v57, %v967_v60  ;;  %v1022_v1 = vadd.f32 %v2082_v57, %v983_v61  ;;  %v968_v2 = vmul.f32 %v1307_v62, %v2080_v51  ;;  %v984_v3 = vmul.f32 %v1355_v63, %v2080_v51 }
 0x184   : > { %1038 = vst [vmem:[%s2092_s23] sm:$0xff] %v1006_v0  ;;  %1054 = vst [vmem:[%s2092_s23 + $0x80] sm:$0xff] %v1022_v1  ;;  %v1007_v4 = vadd.f32 %v2082_v57, %v968_v2  ;;  %v1023_v5 = vadd.f32 %v2082_v57, %v984_v3  ;;  %v1308_v6 = vpop.f32.mrb[4].mxu0  ;;  %v1356_v7 = vpop.f32.mrb[4].mxu1 }
 0x185   : > { %v1309_v8 = vpop.f32.mrb[5].mxu0  ;;  %v1357_v9 = vpop.f32.mrb[5].mxu1 }
 0x186   : > { %1039 = vst [vmem:[%s2092_s23 + $0x8] sm:$0xff] %v1007_v4  ;;  %1055 = vst [vmem:[%s2092_s23 + $0x88] sm:$0xff] %v1023_v5  ;;  %v1310_v10 = vadd.f32 %v1309_v8, %v1308_v6  ;;  %v1358_v11 = vadd.f32 %v1357_v9, %v1356_v7  ;;  %v1311_v12 = vpop.f32.mrb[6].mxu0  ;;  %v1359_v13 = vpop.f32.mrb[6].mxu1 }
 0x187   : > { %v1312_v14 = vpop.f32.mrb[7].mxu0  ;;  %v1360_v15 = vpop.f32.mrb[7].mxu1 }
 0x188   : > { %v969_v16 = vmul.f32 %v1310_v10, %v2080_v51  ;;  %v985_v17 = vmul.f32 %v1358_v11, %v2080_v51  ;;  %v1313_v18 = vadd.f32 %v1312_v14, %v1311_v12  ;;  %v1361_v19 = vadd.f32 %v1360_v15, %v1359_v13 }
 0x18a   : > { %v1008_v20 = vadd.f32 %v2082_v57, %v969_v16  ;;  %v1024_v21 = vadd.f32 %v2082_v57, %v985_v17  ;;  %v970_v22 = vmul.f32 %v1313_v18, %v2080_v51  ;;  %v986_v23 = vmul.f32 %v1361_v19, %v2080_v51 }
 0x18c   : > { %1040 = vst [vmem:[%s2092_s23 + $0x10] sm:$0xff] %v1008_v20  ;;  %1056 = vst [vmem:[%s2092_s23 + $0x90] sm:$0xff] %v1024_v21  ;;  %v1009_v24 = vadd.f32 %v2082_v57, %v970_v22  ;;  %v1025_v25 = vadd.f32 %v2082_v57, %v986_v23  ;;  %v1314_v26 = vpop.f32.mrb[8].mxu0  ;;  %v1362_v27 = vpop.f32.mrb[8].mxu1 }
 0x18d   : > { %v1315_v28 = vpop.f32.mrb[9].mxu0  ;;  %v1363_v29 = vpop.f32.mrb[9].mxu1 }
 0x18e   : > { %1041 = vst [vmem:[%s2092_s23 + $0x18] sm:$0xff] %v1009_v24  ;;  %1057 = vst [vmem:[%s2092_s23 + $0x98] sm:$0xff] %v1025_v25  ;;  %v1316_v30 = vadd.f32 %v1315_v28, %v1314_v26  ;;  %v1364_v31 = vadd.f32 %v1363_v29, %v1362_v27  ;;  %v1317_v32 = vpop.f32.mrb[10].mxu0  ;;  %v1365_v33 = vpop.f32.mrb[10].mxu1 }
 0x18f   : > { %v1318_v34 = vpop.f32.mrb[11].mxu0  ;;  %v1366_v35 = vpop.f32.mrb[11].mxu1 }
 0x190   : > { %v971_v36 = vmul.f32 %v1316_v30, %v2080_v51  ;;  %v987_v37 = vmul.f32 %v1364_v31, %v2080_v51  ;;  %v1319_v38 = vadd.f32 %v1318_v34, %v1317_v32  ;;  %v1367_v39 = vadd.f32 %v1366_v35, %v1365_v33 }
 0x192   : > { %v1010_v40 = vadd.f32 %v2082_v57, %v971_v36  ;;  %v1026_v41 = vadd.f32 %v2082_v57, %v987_v37  ;;  %v972_v42 = vmul.f32 %v1319_v38, %v2080_v51  ;;  %v988_v43 = vmul.f32 %v1367_v39, %v2080_v51 }
 0x194   : > { %1042 = vst [vmem:[%s2092_s23 + $0x20] sm:$0xff] %v1010_v40  ;;  %1058 = vst [vmem:[%s2092_s23 + $0xa0] sm:$0xff] %v1026_v41  ;;  %v1011_v44 = vadd.f32 %v2082_v57, %v972_v42  ;;  %v1027_v45 = vadd.f32 %v2082_v57, %v988_v43  ;;  %v1320_v46 = vpop.f32.mrb[12].mxu0  ;;  %v1368_v47 = vpop.f32.mrb[12].mxu1 }
 0x195   : > { %v1321_v48 = vpop.f32.mrb[13].mxu0  ;;  %v1369_v49 = vpop.f32.mrb[13].mxu1 }
 0x196   : > { %1043 = vst [vmem:[%s2092_s23 + $0x28] sm:$0xff] %v1011_v44  ;;  %1059 = vst [vmem:[%s2092_s23 + $0xa8] sm:$0xff] %v1027_v45  ;;  %v1322_v50 = vadd.f32 %v1321_v48, %v1320_v46  ;;  %v1370_v52 = vadd.f32 %v1369_v49, %v1368_v47  ;;  %v1323_v53 = vpop.f32.mrb[14].mxu0  ;;  %v1371_v54 = vpop.f32.mrb[14].mxu1 }
 0x197   : > { %v1324_v55 = vpop.f32.mrb[15].mxu0  ;;  %v1372_v56 = vpop.f32.mrb[15].mxu1 }
 0x198   : > { %v973_v58 = vmul.f32 %v1322_v50, %v2080_v51  ;;  %v989_v59 = vmul.f32 %v1370_v52, %v2080_v51  ;;  %v1325_v60 = vadd.f32 %v1324_v55, %v1323_v53  ;;  %v1373_v61 = vadd.f32 %v1372_v56, %v1371_v54 }
 0x19a   : > { %v1012_v62 = vadd.f32 %v2082_v57, %v973_v58  ;;  %v1028_v63 = vadd.f32 %v2082_v57, %v989_v59  ;;  %v974_v0 = vmul.f32 %v1325_v60, %v2080_v51  ;;  %v990_v1 = vmul.f32 %v1373_v61, %v2080_v51 }
 0x19c   : > { %1044 = vst [vmem:[%s2092_s23 + $0x30] sm:$0xff] %v1012_v62  ;;  %1060 = vst [vmem:[%s2092_s23 + $0xb0] sm:$0xff] %v1028_v63  ;;  %v1013_v2 = vadd.f32 %v2082_v57, %v974_v0  ;;  %v1029_v3 = vadd.f32 %v2082_v57, %v990_v1  ;;  %v1326_v4 = vpop.f32.mrb[16].mxu0  ;;  %v1374_v5 = vpop.f32.mrb[16].mxu1 }
 0x19d   : > { %v1327_v6 = vpop.f32.mrb[17].mxu0  ;;  %v1375_v7 = vpop.f32.mrb[17].mxu1 }
 0x19e   : > { %1045 = vst [vmem:[%s2092_s23 + $0x38] sm:$0xff] %v1013_v2  ;;  %1061 = vst [vmem:[%s2092_s23 + $0xb8] sm:$0xff] %v1029_v3  ;;  %v1328_v8 = vadd.f32 %v1327_v6, %v1326_v4  ;;  %v1376_v9 = vadd.f32 %v1375_v7, %v1374_v5  ;;  %v1329_v10 = vpop.f32.mrb[18].mxu0  ;;  %v1377_v11 = vpop.f32.mrb[18].mxu1 }
 0x19f   : > { %v1330_v12 = vpop.f32.mrb[19].mxu0  ;;  %v1378_v13 = vpop.f32.mrb[19].mxu1 }
 0x1a0   : > { %v975_v14 = vmul.f32 %v1328_v8, %v2080_v51  ;;  %v991_v15 = vmul.f32 %v1376_v9, %v2080_v51  ;;  %v1331_v16 = vadd.f32 %v1330_v12, %v1329_v10  ;;  %v1379_v17 = vadd.f32 %v1378_v13, %v1377_v11 }
 0x1a2   : > { %v1014_v18 = vadd.f32 %v2082_v57, %v975_v14  ;;  %v1030_v19 = vadd.f32 %v2082_v57, %v991_v15  ;;  %v976_v20 = vmul.f32 %v1331_v16, %v2080_v51  ;;  %v992_v21 = vmul.f32 %v1379_v17, %v2080_v51 }
 0x1a4   : > { %1046 = vst [vmem:[%s2092_s23 + $0x40] sm:$0xff] %v1014_v18  ;;  %1062 = vst [vmem:[%s2092_s23 + $0xc0] sm:$0xff] %v1030_v19  ;;  %v1015_v22 = vadd.f32 %v2082_v57, %v976_v20  ;;  %v1031_v23 = vadd.f32 %v2082_v57, %v992_v21  ;;  %v1332_v24 = vpop.f32.mrb[20].mxu0  ;;  %v1380_v25 = vpop.f32.mrb[20].mxu1 }
 0x1a5   : > { %v1333_v26 = vpop.f32.mrb[21].mxu0  ;;  %v1381_v27 = vpop.f32.mrb[21].mxu1 }
 0x1a6   : > { %1047 = vst [vmem:[%s2092_s23 + $0x48] sm:$0xff] %v1015_v22  ;;  %1063 = vst [vmem:[%s2092_s23 + $0xc8] sm:$0xff] %v1031_v23  ;;  %v1334_v28 = vadd.f32 %v1333_v26, %v1332_v24  ;;  %v1382_v29 = vadd.f32 %v1381_v27, %v1380_v25  ;;  %v1335_v30 = vpop.f32.mrb[22].mxu0  ;;  %v1383_v31 = vpop.f32.mrb[22].mxu1 }
 0x1a7   : > { %v1336_v32 = vpop.f32.mrb[23].mxu0  ;;  %v1384_v33 = vpop.f32.mrb[23].mxu1 }
 0x1a8   : > { %v977_v34 = vmul.f32 %v1334_v28, %v2080_v51  ;;  %v993_v35 = vmul.f32 %v1382_v29, %v2080_v51  ;;  %v1337_v36 = vadd.f32 %v1336_v32, %v1335_v30  ;;  %v1385_v37 = vadd.f32 %v1384_v33, %v1383_v31 }
 0x1aa   : > { %v1016_v38 = vadd.f32 %v2082_v57, %v977_v34  ;;  %v1032_v39 = vadd.f32 %v2082_v57, %v993_v35  ;;  %v978_v40 = vmul.f32 %v1337_v36, %v2080_v51  ;;  %v994_v41 = vmul.f32 %v1385_v37, %v2080_v51 }
 0x1ac   : > { %1048 = vst [vmem:[%s2092_s23 + $0x50] sm:$0xff] %v1016_v38  ;;  %1064 = vst [vmem:[%s2092_s23 + $0xd0] sm:$0xff] %v1032_v39  ;;  %v1017_v42 = vadd.f32 %v2082_v57, %v978_v40  ;;  %v1033_v43 = vadd.f32 %v2082_v57, %v994_v41  ;;  %v1338_v44 = vpop.f32.mrb[24].mxu0  ;;  %v1386_v45 = vpop.f32.mrb[24].mxu1 }
 0x1ad   : > { %v1339_v46 = vpop.f32.mrb[25].mxu0  ;;  %v1387_v47 = vpop.f32.mrb[25].mxu1 }
 0x1ae   : > { %1049 = vst [vmem:[%s2092_s23 + $0x58] sm:$0xff] %v1017_v42  ;;  %1065 = vst [vmem:[%s2092_s23 + $0xd8] sm:$0xff] %v1033_v43  ;;  %v1340_v48 = vadd.f32 %v1339_v46, %v1338_v44  ;;  %v1388_v49 = vadd.f32 %v1387_v47, %v1386_v45  ;;  %v1341_v50 = vpop.f32.mrb[26].mxu0  ;;  %v1389_v52 = vpop.f32.mrb[26].mxu1 }
 0x1af   : > { %v1342_v53 = vpop.f32.mrb[27].mxu0  ;;  %v1390_v54 = vpop.f32.mrb[27].mxu1 }
 0x1b0   : > { %v979_v55 = vmul.f32 %v1340_v48, %v2080_v51  ;;  %v995_v56 = vmul.f32 %v1388_v49, %v2080_v51  ;;  %v1343_v58 = vadd.f32 %v1342_v53, %v1341_v50  ;;  %v1391_v59 = vadd.f32 %v1390_v54, %v1389_v52 }
 0x1b2   : > { %v1018_v60 = vadd.f32 %v2082_v57, %v979_v55  ;;  %v1034_v61 = vadd.f32 %v2082_v57, %v995_v56  ;;  %v980_v62 = vmul.f32 %v1343_v58, %v2080_v51  ;;  %v996_v63 = vmul.f32 %v1391_v59, %v2080_v51 }
 0x1b4   : > { %1050 = vst [vmem:[%s2092_s23 + $0x60] sm:$0xff] %v1018_v60  ;;  %1066 = vst [vmem:[%s2092_s23 + $0xe0] sm:$0xff] %v1034_v61  ;;  %v1019_v0 = vadd.f32 %v2082_v57, %v980_v62  ;;  %v1035_v1 = vadd.f32 %v2082_v57, %v996_v63  ;;  %v1344_v2 = vpop.f32.mrb[28].mxu0  ;;  %v1392_v3 = vpop.f32.mrb[28].mxu1 }
 0x1b5   : > { %v1345_v4 = vpop.f32.mrb[29].mxu0  ;;  %v1393_v5 = vpop.f32.mrb[29].mxu1 }
 0x1b6   : > { %1051 = vst [vmem:[%s2092_s23 + $0x68] sm:$0xff] %v1019_v0  ;;  %1067 = vst [vmem:[%s2092_s23 + $0xe8] sm:$0xff] %v1035_v1  ;;  %v1346_v6 = vadd.f32 %v1345_v4, %v1344_v2  ;;  %v1394_v7 = vadd.f32 %v1393_v5, %v1392_v3  ;;  %v1347_v8 = vpop.f32.mrb[30].mxu0  ;;  %v1395_v9 = vpop.f32.mrb[30].mxu1 }
 0x1b7   : > { %v1348_v10 = vpop.f32.mrb[31].mxu0  ;;  %v1396_v11 = vpop.f32.mrb[31].mxu1 }
 0x1b8   : > { %v981_v12 = vmul.f32 %v1346_v6, %v2080_v51  ;;  %v997_v13 = vmul.f32 %v1394_v7, %v2080_v51  ;;  %v1349_v14 = vadd.f32 %v1348_v10, %v1347_v8  ;;  %v1397_v15 = vadd.f32 %v1396_v11, %v1395_v9 }
 0x1ba   : > { %v1020_v16 = vadd.f32 %v2082_v57, %v981_v12  ;;  %v1036_v17 = vadd.f32 %v2082_v57, %v997_v13  ;;  %v982_v18 = vmul.f32 %v1349_v14, %v2080_v51  ;;  %v998_v19 = vmul.f32 %v1397_v15, %v2080_v51 }
 0x1bc   : > { %1052 = vst [vmem:[%s2092_s23 + $0x70] sm:$0xff] %v1020_v16  ;;  %1068 = vst [vmem:[%s2092_s23 + $0xf0] sm:$0xff] %v1036_v17  ;;  %v1021_v20 = vadd.f32 %v2082_v57, %v982_v18  ;;  %v1037_v21 = vadd.f32 %v2082_v57, %v998_v19 }
 0x1be   : > { %1053 = vst [vmem:[%s2092_s23 + $0x78] sm:$0xff] %v1021_v20  ;;  %1069 = vst [vmem:[%s2092_s23 + $0xf8] sm:$0xff] %v1037_v21 }
 0x1bf   : > { %1704 = shalt.err (!%p1701_p13)
}
 0x1c0   : > { %s1705_s21 = scalar_lea.hbm %s2183_s28, 4096  ;;  %s1709_s9 = scalar_lea.hbm %s2243_s4, 65536 }
 0x1c1   : > { %p1706_p4 = scmp.ne.s32.totalorder %s2183_s28, %s1705_s21  ;;  %p1710_p11 = scmp.lt.u32.totalorder %s2183_s28, %s2243_s4 }
 0x1c2   : > { %p1711_p1 = scmp.lt.u32.totalorder %s1709_s9, %s1705_s21  ;;  %p1713_p12 = scmp.lt.u32.totalorder %s1705_s21, %s2183_s28 }
 0x1c3   : > { %p1707_p2 = pnand %p1706_p4, %p1970_p0 }
 0x1c4   : > { %p1712_p10 = por %p1711_p1, %p1710_p11 }
 0x1c5   : > { %p1708_p8 = pneg %p1707_p2 }
 0x1c6   : > { %p1714_p6 = por %p1713_p12, %p1712_p10 }
 0x1c8   : > { %p1715_p3 = pnand %p1714_p6, %p1708_p8 }
 0x1ca   : > { %1718 = shalt.err (!%p1715_p3)
}
 0x1cb   : > { %s1792_s23 = smov 128   ;;  %s1793_s25 = smov 8  }
 0x1cc   : > { %1428 = dma.vmem_to_hbm [thread:$0]  (%p1970_p0), %s2185_s27, 4096, %s2183_s28, %s1071_s18, %s1792_s23, %s1792_s23, %s1793_s25  }
 0x1cd PF: > { %s2263_s24 = sld [smem:[#allocation16_spill]]  ;;  %p1455_p5 = scmp.ge.s32.totalorder %s1781_s20, 2 }
 0x1ce   : > { %s1100_s22 = sand.u32 1, %s1761_s15  }
 0x1cf   : > { %s1101_s6 = scalar_lea.sflag [#allocation5], %s1100_s22 }
 0x1d3   : > { %p2264_p7 = scmp.ne.s32.totalorder %s2263_s24, 0 }
 0x1d5   : > { %p1445_p9 = pnand %p1455_p5, %p2264_p7 }
 0x1d7   : > { %1756 = dma.done.wait (!%p1445_p9), %s1101_s6, 4096  }
 0x1d8   : > { %1758 = vsyncadd (!%p1445_p9), %s1101_s6, 4294963200  ;;  %s22_s20 = sadd.s32 1, %s1781_s20   ;;  %s2265_s15 = smov %s1765_s16 }
 0x1d9   : > { %p19_p13 = scmp.ge.s32.totalorder %s22_s20, 18   ;;  %s2266_s16 = smov %s1769_s17 }
 0x1da   : > { %s2267_s17 = smov %s1982_s11  ;;  %s2268_s18 = smov %s1777_s19 }
 0x1db   : > { %s2269_s19 = smov %s2271_s26  ;;  %21 = sbr.rel (!%p19_p13) target bundleno = 8 (0x8), region = 104 }
 0x1e2   :  { %1106 = vsyncpa [#allocation4], 1 }
 0x1e3   :  { %1108 = vsyncpa [#allocation4 + $0x1], 1 }
 0x1e4   :  { %1109 = vsyncpa [#allocation7], 1 }
 0x1e5   :  { %1110 = vsyncpa [#allocation10], 1 }
 0x1e6   :  { %1111 = vsyncpa [#allocation5], 1 }
 0x1e7   :  { %1113 = vsyncpa [#allocation5 + $0x1], 1 }

</bundles_post_ra>
